<compile_context>
chip_gen: v7x
topology: tpu7x:2x2x1
jax: 0.10.0
libtpu: 0.0.40
codegen_flags: <defaults>
</compile_context>

<pallas_src>
import jax
import jax.numpy as jnp
from jax import lax
from jax.experimental import pallas as pl
from jax.experimental.pallas import tpu as pltpu

HIDDEN = 256
NUM_OUTPUTS = 10
K_PAD = 128                     # lane-dense padded logits width
DROP_P = 0.5
CONV_CH = 24
QST_DIM = 11
FC1_IN = 5 * 5 * CONV_CH + QST_DIM   # 611 (matches nn.Linear(5*5*24 + 11, 256))
FC1_IN_PAD = 640                      # 611 rounded up to a multiple of 128
NEG_INF = -1e30


def _round_up(x, m):
    return (x + m - 1) // m * m


def _choose_tiling(B):
    """Return (TB, B_pad).  TB is a multiple of 16 (bf16 sublane packing) unless
    the tile covers the whole (tiny) padded batch."""
    if B < 16:
        tb = max(8, _round_up(B, 8))      # single full-extent tile
        return tb, tb
    if B <= 1024:
        # exactly 2 grid steps -> the "parallel" batch axis can shard across
        # v7x's 2 TensorCores (one tile per TC); neutral on v5e/v6e.
        tb = _round_up((B + 1) // 2, 16)
        return tb, 2 * tb
    tb = 512                              # big-batch tile: ~85% of HBM roofline
    return tb, _round_up(B, tb)


def mlp_head_kernel(x_ref, drop_ref, w1_ref, b1_ref, w2_ref, b2_ref,
                    w3_ref, b3_ref, o_ref):
    """One batch tile of: fc1 -> ReLU -> fc2 -> ReLU -> dropout -> fc3 -> log_softmax."""
    # --- fc1 (bf16 MXU operands streamed from HBM, f32 accumulation) ---
    h = jnp.dot(x_ref[...], w1_ref[...],
                preferred_element_type=jnp.float32) + b1_ref[...]
    h = jnp.maximum(h, 0.0)

    # --- fc2 ---
    h = jnp.dot(h.astype(jnp.bfloat16), w2_ref[...],
                preferred_element_type=jnp.float32) + b2_ref[...]
    h = jnp.maximum(h, 0.0)

    # --- dropout (F.dropout defaults: p=0.5, training=True) ---
    # drop_ref holds bf16 0.0 (dropped) or 2.0 == 1/(1-p) (kept); single f32 VPU mul.
    h = h * drop_ref[...].astype(jnp.float32)

    # --- fc3 -> lane-dense padded logits ---
    # Pad lanes have zero weights and a -1e30 bias, so they contribute nothing to
    # the max / exp-sum of the log_softmax below.
    logits = jnp.dot(h.astype(jnp.bfloat16), w3_ref[...],
                     preferred_element_type=jnp.float32) + b3_ref[...]

    # --- log_softmax over the last dim (f32) ---
    m = jnp.max(logits, axis=-1, keepdims=True)
    z = logits - m
    lse = jnp.log(jnp.sum(jnp.exp(z), axis=-1, keepdims=True))
    o_ref[...] = (z - lse).astype(o_ref.dtype)


def mlp_head(x_flat, qst, w1, b1, w2, b2, w3, b3, drop_key):
    """x_flat: (B, 600) f32, qst: (B, 11) f32.
    Linear weights are (in, out); biases are (1, out)."""
    B = x_flat.shape[0]
    feat = x_flat.shape[1] + qst.shape[1]     # 611
    K = w3.shape[1]

    TB, B_pad = _choose_tiling(B)
    n_tiles = B_pad // TB

    # --- fused concat + feature pad, straight to bf16 (one write pass) ---
    x_pad = jnp.concatenate(
        [x_flat.astype(jnp.bfloat16),
         qst.astype(jnp.bfloat16),
         jnp.zeros((B, FC1_IN_PAD - feat), jnp.bfloat16)],
        axis=1)
    if B_pad != B:
        x_pad = jnp.pad(x_pad, ((0, B_pad - B), (0, 0)))

    # --- weights: pad to MXU-friendly shapes, cast to bf16 at the boundary ---
    w1_b = jnp.pad(w1, ((0, FC1_IN_PAD - w1.shape[0]), (0, 0))).astype(jnp.bfloat16)
    w2_b = w2.astype(jnp.bfloat16)
    w3_b = jnp.pad(w3, ((0, 0), (0, K_PAD - K))).astype(jnp.bfloat16)
    b3_p = jnp.pad(b3, ((0, 0), (0, K_PAD - K)), constant_values=NEG_INF)

    # --- dropout keep-mask, pre-scaled by 1/(1-p), streamed as bf16 (0.0 / 2.0
    #     are exact in bf16) ---
    # TODO(synk): on real hardware generate this in-kernel with
    # pltpu.prng_seed(seed + pl.program_id(0)) + pltpu.prng_random_bits((TB, HIDDEN));
    # kept host-side because the in-kernel TPU PRNG does not lower in this sandbox.
    keep = jax.random.bernoulli(drop_key, 1.0 - DROP_P, (B_pad, HIDDEN))
    drop_scale = jnp.where(keep, jnp.bfloat16(1.0 / (1.0 - DROP_P)),
                           jnp.bfloat16(0.0))

    # --- cost estimate: lets XLA overlap the conv front-end / RNG with our DMA ---
    flops = 2 * B_pad * (FC1_IN_PAD * HIDDEN + HIDDEN * HIDDEN + HIDDEN * K_PAD)
    transcendentals = B_pad * (K_PAD + 1)                 # exp per logit + log per row
    bytes_accessed = int(
        x_pad.size * 2 + drop_scale.size * 2 + B_pad * K_PAD * 4          # streams
        + (w1_b.size + w2_b.size + w3_b.size) * 2                         # bf16 weights
        + (b1.size + b2.size + b3_p.size) * 4)                            # f32 biases
    cost = pl.CostEstimate(flops=int(flops),
                           transcendentals=int(transcendentals),
                           bytes_accessed=bytes_accessed)

    out = pl.pallas_call(
        mlp_head_kernel,
        out_shape=jax.ShapeDtypeStruct((B_pad, K_PAD), jnp.float32),
        grid=(n_tiles,),
        in_specs=[
            pl.BlockSpec((TB, FC1_IN_PAD), lambda i: (i, 0)),      # x tile (bf16)
            pl.BlockSpec((TB, HIDDEN), lambda i: (i, 0)),          # dropout tile (bf16)
            pl.BlockSpec((FC1_IN_PAD, HIDDEN), lambda i: (0, 0)),  # w1 (resident)
            pl.BlockSpec((1, HIDDEN), lambda i: (0, 0)),           # b1
            pl.BlockSpec((HIDDEN, HIDDEN), lambda i: (0, 0)),      # w2 (resident)
            pl.BlockSpec((1, HIDDEN), lambda i: (0, 0)),           # b2
            pl.BlockSpec((HIDDEN, K_PAD), lambda i: (0, 0)),       # w3 padded (resident)
            pl.BlockSpec((1, K_PAD), lambda i: (0, 0)),            # b3 padded
        ],
        out_specs=pl.BlockSpec((TB, K_PAD), lambda i: (i, 0)),
        compiler_params=pltpu.CompilerParams(
            dimension_semantics=("parallel",),   # batch axis -> 2 TCs on v7x
        ),
        cost_estimate=cost,
    )(x_pad, drop_scale, w1_b, b1, w2_b, b2, w3_b, b3_p)

    return out[:B, :K]


def conv_input_model(img, conv_params):
    """ConvInputModel forward: 4x [conv3x3 stride2 pad1 -> ReLU -> BatchNorm(batch stats)]."""
    # TODO(synk): conv + batch-statistics BatchNorm front-end is left to plain JAX/XLA;
    # no clean single Pallas kernel for strided conv + cross-batch BN stats here.
    x = img
    for w, b, gamma, beta in conv_params:
        x = lax.conv_general_dilated(
            x, w, window_strides=(2, 2), padding=((1, 1), (1, 1)),
            dimension_numbers=("NCHW", "OIHW", "NCHW"))
        x = x + b[None, :, None, None]
        x = jnp.maximum(x, 0.0)
        mean = jnp.mean(x, axis=(0, 2, 3), keepdims=True)
        var = jnp.var(x, axis=(0, 2, 3), keepdims=True)   # biased, as torch BN uses for normalization
        x = (x - mean) * lax.rsqrt(var + 1e-5)
        x = x * gamma[None, :, None, None] + beta[None, :, None, None]
    return x


def cnn_mlp_forward(img, qst, params, drop_key):
    """CNN_MLP.forward(img, qst) with activation = ReLU (args.gelu=False)."""
    x = conv_input_model(img, params["conv"])
    B = x.shape[0]
    x_flat = x.reshape(B, -1)                 # NCHW flatten == x.view(B, -1)
    return mlp_head(x_flat, qst,
                    params["w1"], params["b1"], params["w2"], params["b2"],
                    params["w3"], params["b3"], drop_key)


def init_params(key):
    ks = jax.random.split(key, 14)

    def linear(kw, kb, fan_in, fan_out):
        bound = 1.0 / (fan_in ** 0.5)
        w = jax.random.uniform(kw, (fan_in, fan_out), jnp.float32, -bound, bound)
        b = jax.random.uniform(kb, (1, fan_out), jnp.float32, -bound, bound)
        return w, b

    def conv(kw, kb, cin, cout):
        bound = 1.0 / ((cin * 9) ** 0.5)
        w = jax.random.uniform(kw, (cout, cin, 3, 3), jnp.float32, -bound, bound)
        b = jax.random.uniform(kb, (cout,), jnp.float32, -bound, bound)
        gamma = jnp.ones((cout,), jnp.float32)
        beta = jnp.zeros((cout,), jnp.float32)
        return (w, b, gamma, beta)

    conv_params = [
        conv(ks[0], ks[1], 3, CONV_CH),
        conv(ks[2], ks[3], CONV_CH, CONV_CH),
        conv(ks[4], ks[5], CONV_CH, CONV_CH),
        conv(ks[6], ks[7], CONV_CH, CONV_CH),
    ]
    w1, b1 = linear(ks[8], ks[9], FC1_IN, HIDDEN)
    w2, b2 = linear(ks[10], ks[11], HIDDEN, HIDDEN)
    w3, b3 = linear(ks[12], ks[13], HIDDEN, NUM_OUTPUTS)
    return {"conv": conv_params,
            "w1": w1, "b1": b1, "w2": w2, "b2": b2, "w3": w3, "b3": b3}


if __name__ == "__main__":
    key = jax.random.PRNGKey(0)
    k_param, k_img, k_qst, k_drop = jax.random.split(key, 4)

    B = 2
    IMG = 75   # 75 -> 38 -> 19 -> 10 -> 5 after four stride-2 pad-1 convs (5*5*24 = 600)
    img = jax.random.normal(k_img, (B, 3, IMG, IMG), jnp.float32)
    qst = jax.random.normal(k_qst, (B, QST_DIM), jnp.float32)

    params = init_params(k_param)

    out = cnn_mlp_forward(img, qst, params, k_drop)
    out = jax.block_until_ready(out)

    assert out.shape == (B, NUM_OUTPUTS), out.shape
    # log_softmax rows should exponentiate-sum to 1
    row_sums = jnp.sum(jnp.exp(out), axis=-1)
    assert bool(jnp.all(jnp.abs(row_sums - 1.0) < 1e-3)), row_sums

    print("KERNEL_OK")
</pallas_src>

<mosaic_0001>
module attributes {stable_mosaic.version = 11 : i64} {
  func.func @mlp_head_kernel(%arg0: i32, %arg1: memref<8x640xbf16, #tpu.memory_space<vmem>>, %arg2: memref<8x256xbf16, #tpu.memory_space<vmem>>, %arg3: memref<640x256xbf16, #tpu.memory_space<vmem>>, %arg4: memref<1x256xf32, #tpu.memory_space<vmem>>, %arg5: memref<256x256xbf16, #tpu.memory_space<vmem>>, %arg6: memref<1x256xf32, #tpu.memory_space<vmem>>, %arg7: memref<256x128xbf16, #tpu.memory_space<vmem>>, %arg8: memref<1x128xf32, #tpu.memory_space<vmem>>, %arg9: memref<8x128xf32, #tpu.memory_space<vmem>>) attributes {dimension_semantics = [#tpu.dimension_semantics<parallel>], iteration_bounds = array<i64: 1>, scalar_prefetch = 0 : i64, scratch_operands = 0 : i64, tpu.core_type = #tpu.core_type<tc>, window_params = [{transform_indices = @transform_0, window_bounds = array<i64: 8, 640>}, {transform_indices = @transform_1, window_bounds = array<i64: 8, 256>}, {pipeline_mode = #tpu.pipeline_mode<synchronous>, transform_indices = @transform_2, window_bounds = array<i64: 640, 256>}, {pipeline_mode = #tpu.pipeline_mode<synchronous>, transform_indices = @transform_3, window_bounds = array<i64: 1, 256>}, {pipeline_mode = #tpu.pipeline_mode<synchronous>, transform_indices = @transform_4, window_bounds = array<i64: 256, 256>}, {pipeline_mode = #tpu.pipeline_mode<synchronous>, transform_indices = @transform_5, window_bounds = array<i64: 1, 256>}, {pipeline_mode = #tpu.pipeline_mode<synchronous>, transform_indices = @transform_6, window_bounds = array<i64: 256, 128>}, {pipeline_mode = #tpu.pipeline_mode<synchronous>, transform_indices = @transform_7, window_bounds = array<i64: 1, 128>}, {transform_indices = @transform_8, window_bounds = array<i64: 8, 128>}]} {
    %c0 = arith.constant 0 : index
    %c0_0 = arith.constant 0 : index
    %0 = vector.load %arg1[%c0, %c0_0] : memref<8x640xbf16, #tpu.memory_space<vmem>>, vector<8x640xbf16>
    %c0_1 = arith.constant 0 : index
    %c0_2 = arith.constant 0 : index
    %1 = vector.load %arg3[%c0_1, %c0_2] : memref<640x256xbf16, #tpu.memory_space<vmem>>, vector<640x256xbf16>
    %cst = arith.constant dense<0.000000e+00> : vector<8x256xf32>
    %2 = tpu.matmul %0, %1, %cst {dimension_numbers = #tpu.dot_dimension_numbers<[1], [0], [0], [1], [0, 0, 1, 1], [], []>} : vector<8x640xbf16>, vector<640x256xbf16>, vector<8x256xf32> -> vector<8x256xf32>
    %c0_3 = arith.constant 0 : index
    %c0_4 = arith.constant 0 : index
    %3 = vector.load %arg4[%c0_3, %c0_4] : memref<1x256xf32, #tpu.memory_space<vmem>>, vector<1x256xf32>
    %4 = vector.broadcast %3 : vector<1x256xf32> to vector<8x256xf32>
    %5 = arith.addf %2, %4 : vector<8x256xf32>
    %cst_5 = arith.constant 0.000000e+00 : f32
    %6 = vector.broadcast %cst_5 : f32 to vector<8x256xf32>
    %7 = arith.maximumf %5, %6 : vector<8x256xf32>
    %8 = arith.truncf %7 : vector<8x256xf32> to vector<8x256xbf16>
    %c0_6 = arith.constant 0 : index
    %c0_7 = arith.constant 0 : index
    %9 = vector.load %arg5[%c0_6, %c0_7] : memref<256x256xbf16, #tpu.memory_space<vmem>>, vector<256x256xbf16>
    %cst_8 = arith.constant dense<0.000000e+00> : vector<8x256xf32>
    %10 = tpu.matmul %8, %9, %cst_8 {dimension_numbers = #tpu.dot_dimension_numbers<[1], [0], [0], [1], [0, 0, 1, 1], [], []>} : vector<8x256xbf16>, vector<256x256xbf16>, vector<8x256xf32> -> vector<8x256xf32>
    %c0_9 = arith.constant 0 : index
    %c0_10 = arith.constant 0 : index
    %11 = vector.load %arg6[%c0_9, %c0_10] : memref<1x256xf32, #tpu.memory_space<vmem>>, vector<1x256xf32>
    %12 = vector.broadcast %11 : vector<1x256xf32> to vector<8x256xf32>
    %13 = arith.addf %10, %12 : vector<8x256xf32>
    %cst_11 = arith.constant 0.000000e+00 : f32
    %14 = vector.broadcast %cst_11 : f32 to vector<8x256xf32>
    %15 = arith.maximumf %13, %14 : vector<8x256xf32>
    %c0_12 = arith.constant 0 : index
    %c0_13 = arith.constant 0 : index
    %16 = vector.load %arg2[%c0_12, %c0_13] : memref<8x256xbf16, #tpu.memory_space<vmem>>, vector<8x256xbf16>
    %17 = arith.extf %16 : vector<8x256xbf16> to vector<8x256xf32>
    %18 = arith.mulf %15, %17 : vector<8x256xf32>
    %19 = arith.truncf %18 : vector<8x256xf32> to vector<8x256xbf16>
    %c0_14 = arith.constant 0 : index
    %c0_15 = arith.constant 0 : index
    %20 = vector.load %arg7[%c0_14, %c0_15] : memref<256x128xbf16, #tpu.memory_space<vmem>>, vector<256x128xbf16>
    %cst_16 = arith.constant dense<0.000000e+00> : vector<8x128xf32>
    %21 = tpu.matmul %19, %20, %cst_16 {dimension_numbers = #tpu.dot_dimension_numbers<[1], [0], [0], [1], [0, 0, 1, 1], [], []>} : vector<8x256xbf16>, vector<256x128xbf16>, vector<8x128xf32> -> vector<8x128xf32>
    %c0_17 = arith.constant 0 : index
    %c0_18 = arith.constant 0 : index
    %22 = vector.load %arg8[%c0_17, %c0_18] : memref<1x128xf32, #tpu.memory_space<vmem>>, vector<1x128xf32>
    %23 = vector.broadcast %22 : vector<1x128xf32> to vector<8x128xf32>
    %24 = arith.addf %21, %23 : vector<8x128xf32>
    %cst_19 = arith.constant dense<0xFF800000> : vector<8xf32>
    %25 = vector.multi_reduction <maximumf>, %24, %cst_19 [1] : vector<8x128xf32> to vector<8xf32>
    %26 = vector.shape_cast %25 : vector<8xf32> to vector<8x1xf32>
    %27 = vector.broadcast %26 : vector<8x1xf32> to vector<8x128xf32>
    %28 = arith.subf %24, %27 : vector<8x128xf32>
    %29 = math.exp %28 : vector<8x128xf32>
    %cst_20 = arith.constant dense<0.000000e+00> : vector<8xf32>
    %30 = vector.multi_reduction <add>, %29, %cst_20 [1] : vector<8x128xf32> to vector<8xf32>
    %31 = vector.shape_cast %30 : vector<8xf32> to vector<8x1xf32>
    %32 = math.log %31 : vector<8x1xf32>
    %33 = vector.broadcast %32 : vector<8x1xf32> to vector<8x128xf32>
    %34 = arith.subf %28, %33 : vector<8x128xf32>
    %c0_21 = arith.constant 0 : index
    %c0_22 = arith.constant 0 : index
    %35 = vector.load %arg9[%c0_21, %c0_22] : memref<8x128xf32, #tpu.memory_space<vmem>>, vector<8x128xf32>
    tpu.vector_store %arg9[%c0_21, %c0_22], %34 {strides = array<i32>} : memref<8x128xf32, #tpu.memory_space<vmem>>, vector<8x128xf32>,
    return
  }
  func.func @transform_0(%arg0: i32) -> (i32, i32) {
    %c0_i32 = arith.constant 0 : i32
    %c0_i32_0 = arith.constant 0 : i32
    return %arg0, %c0_i32 : i32, i32
  }
  func.func @transform_1(%arg0: i32) -> (i32, i32) {
    %c0_i32 = arith.constant 0 : i32
    %c0_i32_0 = arith.constant 0 : i32
    return %arg0, %c0_i32 : i32, i32
  }
  func.func @transform_2(%arg0: i32) -> (i32, i32) {
    %c0_i32 = arith.constant 0 : i32
    %c0_i32_0 = arith.constant 0 : i32
    %c0_i32_1 = arith.constant 0 : i32
    return %c0_i32, %c0_i32_0 : i32, i32
  }
  func.func @transform_3(%arg0: i32) -> (i32, i32) {
    %c0_i32 = arith.constant 0 : i32
    %c0_i32_0 = arith.constant 0 : i32
    %c0_i32_1 = arith.constant 0 : i32
    return %c0_i32, %c0_i32_0 : i32, i32
  }
  func.func @transform_4(%arg0: i32) -> (i32, i32) {
    %c0_i32 = arith.constant 0 : i32
    %c0_i32_0 = arith.constant 0 : i32
    %c0_i32_1 = arith.constant 0 : i32
    return %c0_i32, %c0_i32_0 : i32, i32
  }
  func.func @transform_5(%arg0: i32) -> (i32, i32) {
    %c0_i32 = arith.constant 0 : i32
    %c0_i32_0 = arith.constant 0 : i32
    %c0_i32_1 = arith.constant 0 : i32
    return %c0_i32, %c0_i32_0 : i32, i32
  }
  func.func @transform_6(%arg0: i32) -> (i32, i32) {
    %c0_i32 = arith.constant 0 : i32
    %c0_i32_0 = arith.constant 0 : i32
    %c0_i32_1 = arith.constant 0 : i32
    return %c0_i32, %c0_i32_0 : i32, i32
  }
  func.func @transform_7(%arg0: i32) -> (i32, i32) {
    %c0_i32 = arith.constant 0 : i32
    %c0_i32_0 = arith.constant 0 : i32
    %c0_i32_1 = arith.constant 0 : i32
    return %c0_i32, %c0_i32_0 : i32, i32
  }
  func.func @transform_8(%arg0: i32) -> (i32, i32) {
    %c0_i32 = arith.constant 0 : i32
    %c0_i32_0 = arith.constant 0 : i32
    return %arg0, %c0_i32 : i32, i32
  }
}

</mosaic_0001>

<bundles_post_ra>
// kernel: tpu_custom_call.1
= control target key start
LH: loop header
LB: loop body
LE: loop exit
PB: predicated region body
PF: predicated region fallthrough
CT: control target
= control target key end

     0   :  { %13 = vsyncpa [#allocation3], 0  ;;  %s1855_s0 = inlined_call_operand.hbm [shape: bf16[8,640], index: 0, kind: input, shape index: {}]   ;;  %s1856_s1 = inlined_call_operand.hbm [shape: bf16[8,256], index: 1, kind: input, shape index: {}]   ;;  %s1857_s2 = inlined_call_operand.hbm [shape: bf16[640,256], index: 2, kind: input, shape index: {}]   ;;  %s1858_s3 = inlined_call_operand.vmem [shape: f32[1,256], index: 3, kind: input, shape index: {}]   ;;  %s1859_s4 = inlined_call_operand.hbm [shape: bf16[256,256], index: 4, kind: input, shape index: {}]   ;;  %s1860_s5 = inlined_call_operand.vmem [shape: f32[1,256], index: 5, kind: input, shape index: {}]   ;;  %s1861_s6 = inlined_call_operand.hbm [shape: bf16[256,128], index: 6, kind: input, shape index: {}]   ;;  %s1862_s7 = inlined_call_operand.vmem [shape: f32[1,128], index: 7, kind: input, shape index: {}]   ;;  %s1863_s8 = inlined_call_operand.hbm [shape: f32[8,128], index: 8, kind: output, shape index: {}]  }
   0x1   :  { %14 = vsyncpa [#allocation6], 0 }
   0x2   :  { %15 = vsyncpa [#allocation9], 0 }
   0x3   :  { %16 = vsyncpa [#allocation4], 0  ;;  %s1700_s27 = smov [#allocation5]   ;;  %s1560_s9 = scalar_lea.hbm %s1856_s1, 128 }
   0x4   :  { %s33_s28 = sshll.u32 %s1700_s27, 4  ;;  %p1561_p0 = scmp.ne.s32.totalorder %s1856_s1, %s1560_s9  ;;  %s34_s28 = int_to_ptr.vmem [resolvable:$true] %s33_s28 }
   0x5   :  { %p1564_p1 = scmp.lt.u32.totalorder %s1560_s9, %s1856_s1 }
   0x7   :  { %p1566_p2 = pnand %p1564_p1, %p1561_p0 }
   0x9   :  { %1569 = shalt.err (!%p1566_p2)
}
   0xa   :  { %s1570_s14 = scalar_lea.vmem %s34_s28, 128  ;;  %p1575_p4 = scmp.lt.s32.totalorder %s34_s28, %s34_s28 }
   0xb   :  { %p1571_p3 = scmp.ne.s32.totalorder %s34_s28, %s1570_s14  ;;  %p1576_p5 = scmp.lt.s32.totalorder %s1570_s14, %s1570_s14 }
   0xd   :  { %p1577_p6 = por %p1576_p5, %p1575_p4 }
   0xf   :  { %p1578_p7 = pnand %p1577_p6, %p1571_p3 }
  0x11   :  { %1581 = shalt.err (!%p1578_p7)
}
  0x12   :  { %36 = dma.hbm_to_vmem [thread:$0]  %s1856_s1, 128, %s34_s28, [#allocation6]  }
  0x13   :  { %s1701_s17 = smov [#allocation8]   ;;  %s1702_s19 = smov [#allocation2]  }
  0x14   :  { %s56_s18 = sshll.u32 %s1701_s17, 4  ;;  %s23_s20 = sshll.u32 %s1702_s19, 4  ;;  %s57_s18 = int_to_ptr.vmem [resolvable:$true] %s56_s18  ;;  %s24_s20 = int_to_ptr.vmem [resolvable:$true] %s23_s20 }
  0x15   :  { %s1582_s23 = scalar_lea.hbm %s1859_s4, 4096 }
  0x16   :  { %p1583_p8 = scmp.ne.s32.totalorder %s1859_s4, %s1582_s23  ;;  %p1586_p9 = scmp.lt.u32.totalorder %s1582_s23, %s1859_s4 }
  0x18   :  { %p1588_p10 = pnand %p1586_p9, %p1583_p8 }
  0x1a   :  { %1591 = shalt.err (!%p1588_p10)
}
  0x1b   :  { %s1592_s1 = scalar_lea.vmem %s57_s18, 4096  ;;  %p1597_p12 = scmp.lt.s32.totalorder %s57_s18, %s57_s18 }
  0x1c   :  { %p1593_p11 = scmp.ne.s32.totalorder %s57_s18, %s1592_s1  ;;  %p1598_p13 = scmp.lt.s32.totalorder %s1592_s1, %s1592_s1 }
  0x1e   :  { %p1599_p0 = por %p1598_p13, %p1597_p12 }
  0x20   :  { %p1600_p1 = pnand %p1599_p0, %p1593_p11 }
  0x22   :  { %1603 = shalt.err (!%p1600_p1)
}
  0x23   :  { %s1703_s28 = smov 128   ;;  %s1704_s29 = smov 8  }
  0x24   :  { %62 = dma.hbm_to_vmem [thread:$0]  %s1859_s4, 4096, %s57_s18, [#allocation9], %s1703_s28, %s1703_s28, %s1704_s29  }
  0x25   :  { %s1604_s12 = scalar_lea.hbm %s1855_s0, 320 }
  0x26   :  { %p1605_p2 = scmp.ne.s32.totalorder %s1855_s0, %s1604_s12  ;;  %p1608_p3 = scmp.lt.u32.totalorder %s1604_s12, %s1855_s0 }
  0x28   :  { %p1610_p4 = pnand %p1608_p3, %p1605_p2 }
  0x2a   :  { %1613 = shalt.err (!%p1610_p4)
}
  0x2b   :  { %s1614_s17 = scalar_lea.vmem %s24_s20, 320  ;;  %p1619_p6 = scmp.lt.s32.totalorder %s24_s20, %s24_s20 }
  0x2c   :  { %p1615_p5 = scmp.ne.s32.totalorder %s24_s20, %s1614_s17  ;;  %p1620_p7 = scmp.lt.s32.totalorder %s1614_s17, %s1614_s17 }
  0x2e   :  { %p1621_p8 = por %p1620_p7, %p1619_p6 }
  0x30   :  { %p1622_p9 = pnand %p1621_p8, %p1615_p5 }
  0x32   :  { %1625 = shalt.err (!%p1622_p9)
}
  0x33   :  { %26 = dma.hbm_to_vmem [thread:$0]  %s1855_s0, 320, %s24_s20, [#allocation3]  }
  0x34   :  { %s1705_s19 = smov [#allocation7]   ;;  %s1706_s22 = smov [#allocation10]  }
  0x35   :  { %s42_s21 = sshll.u32 %s1705_s19, 4  ;;  %s70_s23 = sshll.u32 %s1706_s22, 4  ;;  %s43_s21 = int_to_ptr.vmem [resolvable:$true] %s42_s21  ;;  %s71_s23 = int_to_ptr.vmem [resolvable:$true] %s70_s23 }
  0x36   :  { %s1626_s26 = scalar_lea.hbm %s1857_s2, 10240 }
  0x37   :  { %p1627_p10 = scmp.ne.s32.totalorder %s1857_s2, %s1626_s26  ;;  %p1630_p11 = scmp.lt.u32.totalorder %s1626_s26, %s1857_s2 }
  0x39   :  { %p1632_p12 = pnand %p1630_p11, %p1627_p10 }
  0x3b   :  { %1635 = shalt.err (!%p1632_p12)
}
  0x3c   :  { %s1636_s0 = scalar_lea.vmem %s43_s21, 10240  ;;  %p1641_p0 = scmp.lt.s32.totalorder %s43_s21, %s43_s21 }
  0x3d   :  { %p1637_p13 = scmp.ne.s32.totalorder %s43_s21, %s1636_s0  ;;  %p1642_p1 = scmp.lt.s32.totalorder %s1636_s0, %s1636_s0 }
  0x3f   :  { %p1643_p2 = por %p1642_p1, %p1641_p0 }
  0x41   :  { %p1644_p3 = pnand %p1643_p2, %p1637_p13 }
  0x43   :  { %1647 = shalt.err (!%p1644_p3)
}
  0x44   :  { %48 = dma.hbm_to_vmem [thread:$0]  %s1857_s2, 10240, %s43_s21, [#allocation6], %s1703_s28, %s1703_s28, %s1704_s29  }
  0x45   :  { %s1648_s13 = scalar_lea.hbm %s1861_s6, 2048 }
  0x46   :  { %p1649_p4 = scmp.ne.s32.totalorder %s1861_s6, %s1648_s13  ;;  %p1652_p5 = scmp.lt.u32.totalorder %s1648_s13, %s1861_s6 }
  0x48   :  { %p1654_p6 = pnand %p1652_p5, %p1649_p4 }
  0x4a   :  { %1657 = shalt.err (!%p1654_p6)
}
  0x4b   :  { %s1658_s4 = scalar_lea.vmem %s71_s23, 2048  ;;  %p1663_p8 = scmp.lt.s32.totalorder %s71_s23, %s71_s23 }
  0x4c   :  { %p1659_p7 = scmp.ne.s32.totalorder %s71_s23, %s1658_s4  ;;  %p1664_p9 = scmp.lt.s32.totalorder %s1658_s4, %s1658_s4 }
  0x4e   :  { %p1665_p10 = por %p1664_p9, %p1663_p8 }
  0x50   :  { %p1666_p11 = pnand %p1665_p10, %p1659_p7 }
  0x52   :  { %1669 = shalt.err (!%p1666_p11)
}
  0x53   :  { %s1707_s2 = smov 64   ;;  %s1708_s28 = smov 4  }
  0x54   :  { %76 = dma.hbm_to_vmem [thread:$0]  %s1861_s6, 2048, %s71_s23, [#allocation9], %s1707_s2, %s1707_s2, %s1708_s28  }
  0x55   :  { %1692 = dma.done.wait [#allocation3], 320  }
  0x56   :  { %1693 = vsyncadd [#allocation3], 4294966976 }
  0x57   :  { %1694 = dma.done.wait [#allocation6], 10368  }
  0x58   :  { %1695 = vsyncadd [#allocation6], 4294956928 }
  0x59   :  { %1696 = dma.done.wait [#allocation9], 6144  }
  0x5a   :  { %1697 = vsyncadd [#allocation9], 4294961152  ;;  %v1367_v0 = vld [vmem:[#allocation7 + $0x4] ss:$8 sps:$4 sm:$0xff]   ;;  %v1709_v1 = vmov 0   ;;  %s1710_s23 = smov [#allocation11]  }
  0x5b   :  { %722 = vmatprep.mubr.bf16.mxu1 %v1709_v1  ;;  %v1369_v2 = vld [vmem:[#allocation7] ss:$8 sps:$4 sm:$0xff]   ;;  %608 = vmatprep.subr.bf16.mxu0 %v1367_v0  ;;  %v1370_v3 = vld [vmem:[#allocation7 + $0x14] ss:$8 sps:$4 sm:$0xff]   ;;  %v1372_v4 = vld [vmem:[#allocation7 + $0x10] ss:$8 sps:$4 sm:$0xff]  }
  0x5c   :  { %609 = vmatpush1.bf16.msra.mxu0 %v1369_v2  ;;  %v1373_v5 = vld [vmem:[#allocation7 + $0x24] ss:$8 sps:$4 sm:$0xff]   ;;  %v1375_v6 = vld [vmem:[#allocation7 + $0x20] ss:$8 sps:$4 sm:$0xff]   ;;  %v1376_v7 = vld [vmem:[#allocation7 + $0x34] ss:$8 sps:$4 sm:$0xff]  }
  0x5d   :  { %610 = vmatprep.subr.bf16.mxu0 %v1370_v3  ;;  %v1378_v8 = vld [vmem:[#allocation7 + $0x30] ss:$8 sps:$4 sm:$0xff]   ;;  %v1379_v9 = vld [vmem:[#allocation7 + $0x44] ss:$8 sps:$4 sm:$0xff]   ;;  %v1381_v10 = vld [vmem:[#allocation7 + $0x40] ss:$8 sps:$4 sm:$0xff]  }
  0x5e   :  { %v1382_v11 = vld [vmem:[#allocation7 + $0x54] ss:$8 sps:$4 sm:$0xff]   ;;  %v1384_v12 = vld [vmem:[#allocation7 + $0x50] ss:$8 sps:$4 sm:$0xff]   ;;  %v1385_v13 = vld [vmem:[#allocation7 + $0x64] ss:$8 sps:$4 sm:$0xff]  }
  0x5f   :  { %v1822_v14 = vld [vmem:[#allocation2] sm:$0xff]  ;;  %v1388_v17 = vld [vmem:[#allocation7 + $0x74] ss:$8 sps:$4 sm:$0xff]   ;;  %v1390_v18 = vld [vmem:[#allocation7 + $0x70] ss:$8 sps:$4 sm:$0xff]   ;;  %s1181_s24 = sshll.u32 %s1710_s23, 4  ;;  %s1182_s24 = int_to_ptr.vmem [resolvable:$true] %s1181_s24 }
  0x60   :  { %611 = vmatpush1.bf16.msra.mxu0 %v1372_v4  ;;  %v1193_v15 = vcombine.high %v1822_v14, %v1822_v14  ;;  %v1387_v16 = vld [vmem:[#allocation7 + $0x60] ss:$8 sps:$4 sm:$0xff]   ;;  %v1391_v19 = vld [vmem:[#allocation7 + $0x84] ss:$8 sps:$4 sm:$0xff]   ;;  %v1394_v21 = vld [vmem:[#allocation7 + $0x94] ss:$8 sps:$4 sm:$0xff]   ;;  %v1192_v54 = vcombine.low %v1822_v14, %v1822_v14  ;;  %p1675_p13 = scmp.lt.s32.totalorder %s1182_s24, %s1182_s24 }
  0x61   :  { %612 = vmatprep.subr.bf16.mxu0 %v1373_v5  ;;  %v1393_v20 = vld [vmem:[#allocation7 + $0x80] ss:$8 sps:$4 sm:$0xff]   ;;  %v1441_v22 = vld [vmem:[#allocation7 + $0x204] ss:$8 sps:$4 sm:$0xff]   ;;  %v1396_v23 = vld [vmem:[#allocation7 + $0x90] ss:$8 sps:$4 sm:$0xff]  }
  0x62   :  { %640 = vmatprep.mubr.bf16.mxu0 %v1193_v15  ;;  %v1446_v24 = vld [vmem:[#allocation7 + $0x200] ss:$8 sps:$4 sm:$0xff]   ;;  %690 = vmatprep.subr.bf16.mxu1 %v1441_v22  ;;  %v1447_v25 = vld [vmem:[#allocation7 + $0x214] ss:$8 sps:$4 sm:$0xff]   ;;  %v1397_v26 = vld [vmem:[#allocation7 + $0xa4] ss:$8 sps:$4 sm:$0xff]  }
  0x63   :  { %691 = vmatpush1.bf16.msra.mxu1 %v1446_v24  ;;  %v1452_v27 = vld [vmem:[#allocation7 + $0x210] ss:$8 sps:$4 sm:$0xff]   ;;  %v1453_v28 = vld [vmem:[#allocation7 + $0x224] ss:$8 sps:$4 sm:$0xff]   ;;  %v1399_v29 = vld [vmem:[#allocation7 + $0xa0] ss:$8 sps:$4 sm:$0xff]  }
  0x64   :  { %613 = vmatpush1.bf16.msra.mxu0 %v1375_v6  ;;  %692 = vmatprep.subr.bf16.mxu1 %v1447_v25  ;;  %v1400_v30 = vld [vmem:[#allocation7 + $0xb4] ss:$8 sps:$4 sm:$0xff]   ;;  %v1458_v31 = vld [vmem:[#allocation7 + $0x220] ss:$8 sps:$4 sm:$0xff]   ;;  %v1402_v33 = vld [vmem:[#allocation7 + $0xb0] ss:$8 sps:$4 sm:$0xff]  }
  0x65   :  { %614 = vmatprep.subr.bf16.mxu0 %v1376_v7  ;;  %v1459_v32 = vld [vmem:[#allocation7 + $0x234] ss:$8 sps:$4 sm:$0xff]   ;;  %v1403_v34 = vld [vmem:[#allocation7 + $0xc4] ss:$8 sps:$4 sm:$0xff]   ;;  %v1464_v35 = vld [vmem:[#allocation7 + $0x230] ss:$8 sps:$4 sm:$0xff]  }
  0x66   :  { %v1465_v36 = vld [vmem:[#allocation7 + $0x244] ss:$8 sps:$4 sm:$0xff]   ;;  %v1405_v37 = vld [vmem:[#allocation7 + $0xc0] ss:$8 sps:$4 sm:$0xff]   ;;  %v1406_v38 = vld [vmem:[#allocation7 + $0xd4] ss:$8 sps:$4 sm:$0xff]  }
  0x67   :  { %693 = vmatpush1.bf16.msra.mxu1 %v1452_v27  ;;  %v1470_v39 = vld [vmem:[#allocation7 + $0x240] ss:$8 sps:$4 sm:$0xff]   ;;  %v1471_v40 = vld [vmem:[#allocation7 + $0x254] ss:$8 sps:$4 sm:$0xff]   ;;  %v1408_v41 = vld [vmem:[#allocation7 + $0xd0] ss:$8 sps:$4 sm:$0xff]  }
  0x68   :  { %615 = vmatpush1.bf16.msra.mxu0 %v1378_v8  ;;  %694 = vmatprep.subr.bf16.mxu1 %v1453_v28  ;;  %v1409_v42 = vld [vmem:[#allocation7 + $0xe4] ss:$8 sps:$4 sm:$0xff]   ;;  %v1476_v43 = vld [vmem:[#allocation7 + $0x250] ss:$8 sps:$4 sm:$0xff]   ;;  %v1411_v45 = vld [vmem:[#allocation7 + $0xe0] ss:$8 sps:$4 sm:$0xff]  }
  0x69   :  { %616 = vmatprep.subr.bf16.mxu0 %v1379_v9  ;;  %v1477_v44 = vld [vmem:[#allocation7 + $0x264] ss:$8 sps:$4 sm:$0xff]   ;;  %v1412_v46 = vld [vmem:[#allocation7 + $0xf4] ss:$8 sps:$4 sm:$0xff]   ;;  %v1482_v47 = vld [vmem:[#allocation7 + $0x260] ss:$8 sps:$4 sm:$0xff]  }
  0x6a   :  { %v1483_v48 = vld [vmem:[#allocation7 + $0x274] ss:$8 sps:$4 sm:$0xff]   ;;  %v1414_v49 = vld [vmem:[#allocation7 + $0xf0] ss:$8 sps:$4 sm:$0xff]   ;;  %v1419_v50 = vld [vmem:[#allocation7 + $0x104] ss:$8 sps:$4 sm:$0xff]  }
  0x6b   :  { %695 = vmatpush1.bf16.msra.mxu1 %v1458_v31  ;;  %v1488_v51 = vld [vmem:[#allocation7 + $0x270] ss:$8 sps:$4 sm:$0xff]   ;;  %v1494_v53 = vld [vmem:[#allocation8 + $0x4] ss:$8 sps:$4 sm:$0xff]   ;;  %v1417_v55 = vld [vmem:[#allocation7 + $0x100] ss:$8 sps:$4 sm:$0xff]  }
  0x6c   :  { %617 = vmatpush1.bf16.msra.mxu0 %v1381_v10  ;;  %696 = vmatprep.subr.bf16.mxu1 %v1459_v32  ;;  %v1826_v52 = vld [vmem:[#allocation2 + $0x8] sm:$0xff]  ;;  %v1422_v56 = vld [vmem:[#allocation7 + $0x114] ss:$8 sps:$4 sm:$0xff]   ;;  %v1492_v59 = vld [vmem:[#allocation8] ss:$8 sps:$4 sm:$0xff]  }
  0x6d   :  { %618 = vmatprep.subr.bf16.mxu0 %v1382_v11  ;;  %v1195_v57 = vcombine.high %v1826_v52, %v1826_v52  ;;  %v1491_v58 = vld [vmem:[#allocation2 + $0x10] ss:$0 sps:$4 sm:$0xff]   ;;  %v1420_v61 = vld [vmem:[#allocation7 + $0x110] ss:$8 sps:$4 sm:$0xff]   ;;  %v1425_v62 = vld [vmem:[#allocation7 + $0x124] ss:$8 sps:$4 sm:$0xff]  }
  0x6e   :  { %v1497_v60 = vld [vmem:[#allocation8 + $0x14] ss:$8 sps:$4 sm:$0xff]   ;;  %v1495_v63 = vld [vmem:[#allocation8 + $0x10] ss:$8 sps:$4 sm:$0xff]   ;;  %v1423_v0 = vld [vmem:[#allocation7 + $0x120] ss:$8 sps:$4 sm:$0xff]  }
  0x6f   :  { %697 = vmatpush1.bf16.msra.mxu1 %v1464_v35  ;;  %v1500_v1 = vld [vmem:[#allocation8 + $0x24] ss:$8 sps:$4 sm:$0xff]   ;;  %v1428_v2 = vld [vmem:[#allocation7 + $0x134] ss:$8 sps:$4 sm:$0xff]   ;;  %v1498_v3 = vld [vmem:[#allocation8 + $0x20] ss:$8 sps:$4 sm:$0xff]  }
  0x70   :  { %619 = vmatpush1.bf16.msra.mxu0 %v1384_v12  ;;  %698 = vmatprep.subr.bf16.mxu1 %v1465_v36  ;;  %v1503_v4 = vld [vmem:[#allocation8 + $0x34] ss:$8 sps:$4 sm:$0xff]   ;;  %v1426_v5 = vld [vmem:[#allocation7 + $0x130] ss:$8 sps:$4 sm:$0xff]   ;;  %v1431_v6 = vld [vmem:[#allocation7 + $0x144] ss:$8 sps:$4 sm:$0xff]  }
  0x71   :  { %620 = vmatprep.subr.bf16.mxu0 %v1385_v13  ;;  %v1501_v7 = vld [vmem:[#allocation8 + $0x30] ss:$8 sps:$4 sm:$0xff]   ;;  %v1506_v8 = vld [vmem:[#allocation8 + $0x44] ss:$8 sps:$4 sm:$0xff]   ;;  %v1429_v9 = vld [vmem:[#allocation7 + $0x140] ss:$8 sps:$4 sm:$0xff]  }
  0x72   :  { %v1434_v10 = vld [vmem:[#allocation7 + $0x154] ss:$8 sps:$4 sm:$0xff]   ;;  %v1504_v11 = vld [vmem:[#allocation8 + $0x40] ss:$8 sps:$4 sm:$0xff]   ;;  %v1432_v13 = vld [vmem:[#allocation7 + $0x150] ss:$8 sps:$4 sm:$0xff]  }
  0x73   :  { %699 = vmatpush1.bf16.msra.mxu1 %v1470_v39  ;;  %v1509_v12 = vld [vmem:[#allocation8 + $0x54] ss:$8 sps:$4 sm:$0xff]   ;;  %v1437_v14 = vld [vmem:[#allocation7 + $0x164] ss:$8 sps:$4 sm:$0xff]   ;;  %v1507_v15 = vld [vmem:[#allocation8 + $0x50] ss:$8 sps:$4 sm:$0xff]  }
  0x74   :  { %621 = vmatpush1.bf16.msra.mxu0 %v1387_v16  ;;  %700 = vmatprep.subr.bf16.mxu1 %v1471_v40  ;;  %v1512_v16 = vld [vmem:[#allocation8 + $0x64] ss:$8 sps:$4 sm:$0xff]   ;;  %v1443_v25 = vld [vmem:[#allocation7 + $0x180] ss:$8 sps:$4 sm:$0xff]   ;;  %v1521_v28 = vld [vmem:[#allocation8 + $0x94] ss:$8 sps:$4 sm:$0xff]  }
  0x75   :  { %622 = vmatprep.subr.bf16.mxu0 %v1388_v17  ;;  %v1435_v17 = vld [vmem:[#allocation7 + $0x160] ss:$8 sps:$4 sm:$0xff]   ;;  %v1445_v22 = vld [vmem:[#allocation7 + $0x184] ss:$8 sps:$4 sm:$0xff]   ;;  %v1519_v31 = vld [vmem:[#allocation8 + $0x90] ss:$8 sps:$4 sm:$0xff]  }
  0x76   :  { %v1518_v24 = vld [vmem:[#allocation8 + $0x84] ss:$8 sps:$4 sm:$0xff]   ;;  %v1516_v27 = vld [vmem:[#allocation8 + $0x80] ss:$8 sps:$4 sm:$0xff]   ;;  %v1527_v36 = vld [vmem:[#allocation8 + $0xb4] ss:$8 sps:$4 sm:$0xff]  }
  0x77   :  { %701 = vmatpush1.bf16.msra.mxu1 %v1476_v43  ;;  %v1524_v32 = vld [vmem:[#allocation8 + $0xa4] ss:$8 sps:$4 sm:$0xff]   ;;  %v1522_v35 = vld [vmem:[#allocation8 + $0xa0] ss:$8 sps:$4 sm:$0xff]   ;;  %v1525_v39 = vld [vmem:[#allocation8 + $0xb0] ss:$8 sps:$4 sm:$0xff]  }
  0x78   :  { %623 = vmatpush1.bf16.msra.mxu0 %v1390_v18  ;;  %702 = vmatprep.subr.bf16.mxu1 %v1477_v44  ;;  %v1440_v18 = vld [vmem:[#allocation7 + $0x174] ss:$8 sps:$4 sm:$0xff]   ;;  %v1530_v40 = vld [vmem:[#allocation8 + $0xc4] ss:$8 sps:$4 sm:$0xff]   ;;  %v1528_v43 = vld [vmem:[#allocation8 + $0xc0] ss:$8 sps:$4 sm:$0xff]  }
  0x79   :  { %624 = vmatprep.subr.bf16.mxu0 %v1391_v19  ;;  %v1510_v19 = vld [vmem:[#allocation8 + $0x60] ss:$8 sps:$4 sm:$0xff]   ;;  %v1473_v44 = vld [vmem:[#allocation7 + $0x1d0] ss:$8 sps:$4 sm:$0xff]  }
  0x7b   :  { %703 = vmatpush1.bf16.msra.mxu1 %v1482_v47  ;;  %v1487_v47 = vld [vmem:[#allocation7 + $0x1f4] ss:$8 sps:$4 sm:$0xff]  }
  0x7c   :  { %625 = vmatpush1.bf16.msra.mxu0 %v1393_v20  ;;  %704 = vmatprep.subr.bf16.mxu1 %v1483_v48  ;;  %v1515_v20 = vld [vmem:[#allocation8 + $0x74] ss:$8 sps:$4 sm:$0xff]   ;;  %v1485_v48 = vld [vmem:[#allocation7 + $0x1f0] ss:$8 sps:$4 sm:$0xff]  }
  0x7d   :  { %626 = vmatprep.subr.bf16.mxu0 %v1394_v21  ;;  %v1438_v21 = vld [vmem:[#allocation7 + $0x170] ss:$8 sps:$4 sm:$0xff]  }
  0x7f   :  { %705 = vmatpush1.bf16.msra.mxu1 %v1488_v51  ;;  %v1533_v51 = vld [vmem:[#allocation8 + $0xd4] ss:$8 sps:$4 sm:$0xff]  }
  0x80   :  { %627 = vmatpush1.bf16.msra.mxu0 %v1396_v23  ;;  %939 = vmatprep.subr.bf16.mxu1 %v1494_v53  ;;  %v1513_v23 = vld [vmem:[#allocation8 + $0x70] ss:$8 sps:$4 sm:$0xff]   ;;  %v1536_v53 = vld [vmem:[#allocation8 + $0xe4] ss:$8 sps:$4 sm:$0xff]  }
  0x81   :  { %628 = vmatprep.subr.bf16.mxu0 %v1397_v26  ;;  %v1451_v26 = vld [vmem:[#allocation7 + $0x194] ss:$8 sps:$4 sm:$0xff]  }
  0x82   :  { %723 = vmatmul.mubr.bf16.vlgmr.msra.gmra.mrb[0].mxu1 %v1491_v58 }
  0x83   :  { %940 = vmatpush1.bf16.msra.mxu1 %v1492_v59 }
  0x84   :  { %629 = vmatpush1.bf16.msra.mxu0 %v1399_v29  ;;  %941 = vmatprep.subr.bf16.mxu1 %v1497_v60  ;;  %v1449_v29 = vld [vmem:[#allocation7 + $0x190] ss:$8 sps:$4 sm:$0xff]  }
  0x85   :  { %630 = vmatprep.subr.bf16.mxu0 %v1400_v30  ;;  %v1457_v30 = vld [vmem:[#allocation7 + $0x1a4] ss:$8 sps:$4 sm:$0xff]  }
  0x87   :  { %942 = vmatpush1.bf16.msra.mxu1 %v1495_v63 }
  0x88   :  { %631 = vmatpush1.bf16.msra.mxu0 %v1402_v33  ;;  %943 = vmatprep.subr.bf16.mxu1 %v1500_v1  ;;  %v1455_v33 = vld [vmem:[#allocation7 + $0x1a0] ss:$8 sps:$4 sm:$0xff]  }
  0x89   :  { %632 = vmatprep.subr.bf16.mxu0 %v1403_v34  ;;  %v1463_v34 = vld [vmem:[#allocation7 + $0x1b4] ss:$8 sps:$4 sm:$0xff]  }
  0x8b   :  { %944 = vmatpush1.bf16.msra.mxu1 %v1498_v3 }
  0x8c   :  { %633 = vmatpush1.bf16.msra.mxu0 %v1405_v37  ;;  %945 = vmatprep.subr.bf16.mxu1 %v1503_v4  ;;  %v1461_v37 = vld [vmem:[#allocation7 + $0x1b0] ss:$8 sps:$4 sm:$0xff]  }
  0x8d   :  { %634 = vmatprep.subr.bf16.mxu0 %v1406_v38  ;;  %v1469_v38 = vld [vmem:[#allocation7 + $0x1c4] ss:$8 sps:$4 sm:$0xff]  }
  0x8f   :  { %946 = vmatpush1.bf16.msra.mxu1 %v1501_v7 }
  0x90   :  { %635 = vmatpush1.bf16.msra.mxu0 %v1408_v41  ;;  %947 = vmatprep.subr.bf16.mxu1 %v1506_v8  ;;  %v1467_v41 = vld [vmem:[#allocation7 + $0x1c0] ss:$8 sps:$4 sm:$0xff]  }
  0x91   :  { %636 = vmatprep.subr.bf16.mxu0 %v1409_v42  ;;  %v1475_v42 = vld [vmem:[#allocation7 + $0x1d4] ss:$8 sps:$4 sm:$0xff]  }
  0x93   :  { %948 = vmatpush1.bf16.msra.mxu1 %v1504_v11 }
  0x94   :  { %637 = vmatpush1.bf16.msra.mxu0 %v1411_v45  ;;  %949 = vmatprep.subr.bf16.mxu1 %v1509_v12  ;;  %v1481_v45 = vld [vmem:[#allocation7 + $0x1e4] ss:$8 sps:$4 sm:$0xff]  }
  0x95   :  { %638 = vmatprep.subr.bf16.mxu0 %v1412_v46  ;;  %v1479_v46 = vld [vmem:[#allocation7 + $0x1e0] ss:$8 sps:$4 sm:$0xff]  }
  0x97   :  { %950 = vmatpush1.bf16.msra.mxu1 %v1507_v15  ;;  %v1541_v15 = vld [vmem:[#allocation10] sm:$0xff]  }
  0x98   :  { %639 = vmatpush1.bf16.msra.mxu0 %v1414_v49  ;;  %951 = vmatprep.subr.bf16.mxu1 %v1512_v16  ;;  %v1194_v49 = vcombine.low %v1826_v52, %v1826_v52 }
  0x99   :  { %649 = vmatprep.subr.bf16.mxu0 %v1419_v50  ;;  %v1531_v50 = vld [vmem:[#allocation8 + $0xd0] ss:$8 sps:$4 sm:$0xff]  }
  0x9b   :  { %641 = vmatmul.mubr.bf16.vlgmr.msra.gmra.mrb[0].mxu0 %v1192_v54  ;;  %952 = vmatpush1.bf16.msra.mxu1 %v1510_v19  ;;  %v1534_v54 = vld [vmem:[#allocation8 + $0xe0] ss:$8 sps:$4 sm:$0xff]   ;;  %v1544_v19 = vld [vmem:[#allocation10 + $0x50] sm:$0xff]  }
  0x9c   :  { %650 = vmatpush1.bf16.msra.mxu0 %v1417_v55  ;;  %681 = vmatprep.mubr.bf16.mxu0 %v1195_v57  ;;  %v1539_v55 = vld [vmem:[#allocation8 + $0xf4] ss:$8 sps:$4 sm:$0xff]   ;;  %v1540_v57 = vld [vmem:[#allocation10 + $0x40] sm:$0xff]  }
  0x9d   :  { %651 = vmatprep.subr.bf16.mxu0 %v1422_v56  ;;  %953 = vmatprep.subr.bf16.mxu1 %v1515_v20  ;;  %v1537_v56 = vld [vmem:[#allocation8 + $0xf0] ss:$8 sps:$4 sm:$0xff]  }
  0x9e   :  { %v1545_v20 = vld [vmem:[#allocation10 + $0x10] sm:$0xff]  }
  0x9f   :  { %954 = vmatpush1.bf16.msra.mxu1 %v1513_v23  ;;  %v1548_v23 = vld [vmem:[#allocation10 + $0x60] sm:$0xff]  }
  0xa0   :  { %652 = vmatpush1.bf16.msra.mxu0 %v1420_v61  ;;  %955 = vmatprep.subr.bf16.mxu1 %v1518_v24  ;;  %v180_v61 = vlaneseq  ;;  %v1549_v24 = vld [vmem:[#allocation10 + $0x20] sm:$0xff]  }
  0xa1   :  { %653 = vmatprep.subr.bf16.mxu0 %v1425_v62 }
  0xa2   :  { %v181_v62 = vshrl.u32 %v180_v61, 7 }
  0xa3   :  { %956 = vmatpush1.bf16.msra.mxu1 %v1516_v27  ;;  %v1552_v27 = vld [vmem:[#allocation10 + $0x70] sm:$0xff]  }
  0xa4   :  { %654 = vmatpush1.bf16.msra.mxu0 %v1423_v0  ;;  %957 = vmatprep.subr.bf16.mxu1 %v1521_v28  ;;  %v182_v63 = vsub.s32 0, %v181_v62  ;;  %v178_v0 = vld [vmem:[%s1858_s3] sm:$0x3]  ;;  %v186_v1 = vsub.s32 1, %v181_v62  ;;  %v1553_v28 = vld [vmem:[#allocation10 + $0x30] sm:$0xff]  }
  0xa5   :  { %655 = vmatprep.subr.bf16.mxu0 %v1428_v2 }
  0xa6   :  { %v183_v2 = vrot.slane %v178_v0, %v182_v63  ;;  %v187_v3 = vrot.slane %v178_v0, %v186_v1 }
  0xa7   :  { %958 = vmatpush1.bf16.msra.mxu1 %v1519_v31  ;;  %v767_v31 = vld [vmem:[%s1860_s5] sm:$0x3] }
  0xa8   :  { %656 = vmatpush1.bf16.msra.mxu0 %v1426_v5  ;;  %959 = vmatprep.subr.bf16.mxu1 %v1524_v32  ;;  %v772_v32 = vrot.slane %v767_v31, %v182_v63 }
  0xa9   :  { %657 = vmatprep.subr.bf16.mxu0 %v1431_v6 }
  0xab   :  { %960 = vmatpush1.bf16.msra.mxu1 %v1522_v35 }
  0xac   :  { %658 = vmatpush1.bf16.msra.mxu0 %v1429_v9  ;;  %961 = vmatprep.subr.bf16.mxu1 %v1527_v36 }
  0xad   :  { %659 = vmatprep.subr.bf16.mxu0 %v1434_v10 }
  0xaf   :  { %962 = vmatpush1.bf16.msra.mxu1 %v1525_v39 }
  0xb0   :  { %660 = vmatpush1.bf16.msra.mxu0 %v1432_v13  ;;  %963 = vmatprep.subr.bf16.mxu1 %v1530_v40 }
  0xb1   :  { %661 = vmatprep.subr.bf16.mxu0 %v1437_v14 }
  0xb3   :  { %964 = vmatpush1.bf16.msra.mxu1 %v1528_v43 }
  0xb4   :  { %662 = vmatpush1.bf16.msra.mxu0 %v1435_v17  ;;  %965 = vmatprep.subr.bf16.mxu1 %v1533_v51  ;;  %v1542_v17 = vld [vmem:[#allocation10 + $0x48] sm:$0xff]   ;;  %v1309_v51 = vld [vmem:[%s1862_s7] ss:$0 sm:$0xff]  ;;  %s1670_s7 = scalar_lea.vmem %s1182_s24, 128 }
  0xb5   :  { %663 = vmatprep.subr.bf16.mxu0 %v1440_v18  ;;  %v1543_v18 = vld [vmem:[#allocation10 + $0x8] sm:$0xff]   ;;  %p1671_p12 = scmp.ne.s32.totalorder %s1182_s24, %s1670_s7  ;;  %p1676_p0 = scmp.lt.s32.totalorder %s1670_s7, %s1670_s7 }
  0xb7   :  { %966 = vmatpush1.bf16.msra.mxu1 %v1531_v50  ;;  %p1677_p1 = por %p1676_p0, %p1675_p13 }
  0xb8   :  { %664 = vmatpush1.bf16.msra.mxu0 %v1438_v21  ;;  %967 = vmatprep.subr.bf16.mxu1 %v1536_v53  ;;  %v1546_v21 = vld [vmem:[#allocation10 + $0x58] sm:$0xff]  }
  0xb9   :  { %665 = vmatprep.subr.bf16.mxu0 %v1445_v22  ;;  %v1547_v22 = vld [vmem:[#allocation10 + $0x18] sm:$0xff]   ;;  %p1678_p2 = pnand %p1677_p1, %p1671_p12 }
  0xbb   :  { %968 = vmatpush1.bf16.msra.mxu1 %v1534_v54 }
  0xbc   :  { %666 = vmatpush1.bf16.msra.mxu0 %v1443_v25  ;;  %969 = vmatprep.subr.bf16.mxu1 %v1539_v55  ;;  %v1550_v25 = vld [vmem:[#allocation10 + $0x68] sm:$0xff]  }
  0xbd   :  { %667 = vmatprep.subr.bf16.mxu0 %v1451_v26  ;;  %v1551_v26 = vld [vmem:[#allocation10 + $0x28] sm:$0xff]  }
  0xbf   :  { %970 = vmatpush1.bf16.msra.mxu1 %v1537_v56 }
  0xc0   :  { %668 = vmatpush1.bf16.msra.mxu0 %v1449_v29  ;;  %1326 = vmatprep.subr.bf16.mxu1 %v1540_v57  ;;  %v1554_v29 = vld [vmem:[#allocation10 + $0x78] sm:$0xff]  }
  0xc1   :  { %669 = vmatprep.subr.bf16.mxu0 %v1457_v30  ;;  %v1555_v30 = vld [vmem:[#allocation10 + $0x38] sm:$0xff]  }
  0xc4   :  { %670 = vmatpush1.bf16.msra.mxu0 %v1455_v33  ;;  %v982_v33 = vld [vmem:[#allocation5] sm:$0xff] }
  0xc5   :  { %671 = vmatprep.subr.bf16.mxu0 %v1463_v34  ;;  %v776_v34 = vrot.slane %v767_v31, %v186_v1  ;;  %v984_v40 = vunpack.c.h.bf16 %v982_v33 }
  0xc8   :  { %672 = vmatpush1.bf16.msra.mxu0 %v1461_v37  ;;  %v983_v37 = vunpack.c.l.bf16 %v982_v33 }
  0xc9   :  { %673 = vmatprep.subr.bf16.mxu0 %v1469_v38 }
  0xcc   :  { %674 = vmatpush1.bf16.msra.mxu0 %v1467_v41 }
  0xcd   :  { %675 = vmatprep.subr.bf16.mxu0 %v1475_v42 }
  0xd0   :  { %676 = vmatpush1.bf16.msra.mxu0 %v1473_v44 }
  0xd1   :  { %677 = vmatprep.subr.bf16.mxu0 %v1481_v45 }
  0xd4   :  { %678 = vmatpush1.bf16.msra.mxu0 %v1479_v46 }
  0xd5   :  { %679 = vmatprep.subr.bf16.mxu0 %v1487_v47 }
  0xd8   :  { %680 = vmatpush1.bf16.msra.mxu0 %v1485_v48 }
  0xdb   :  { %682 = vmatmul.mubr.bf16.vlgmr.msra.gmra.mrb[0].mxu0 %v1194_v49 }
 0x155   :  { %v724_v58 = vpop.f32.mrb[0].mxu1 }
 0x156   :  { %v726_v59 = vpop.f32.mrb[1].mxu1 }
 0x157   :  { %v728_v60 = vpop.f32.mrb[2].mxu1 }
 0x158   :  { %v729_v52 = vpop.f32.mrb[3].mxu1 }
 0x1ae   :  { %v683_v4 = vpop.f32.mrb[0].mxu0 }
 0x1af   :  { %v1348_v5 = vadd.f32 %v683_v4, %v183_v2  ;;  %v685_v6 = vpop.f32.mrb[1].mxu0 }
 0x1b0   :  { %v1350_v7 = vadd.f32 %v685_v6, %v187_v3  ;;  %v687_v8 = vpop.f32.mrb[2].mxu0 }
 0x1b1   :  { %v1349_v9 = vadd.f32 %v1348_v5, %v724_v58  ;;  %v688_v10 = vpop.f32.mrb[3].mxu0 }
 0x1b2   :  { %v1351_v11 = vadd.f32 %v1350_v7, %v726_v59 }
 0x1b3   :  { %v731_v12 = vmax.f32 %v1349_v9, 0.0 }
 0x1b4   :  { %v732_v13 = vmax.f32 %v1351_v11, 0.0 }
 0x1b5   :  { %v733_v16 = vpack.c.bf16 %v731_v12, %v731_v12 }
 0x1b6   :  { %v734_v14 = vpack.c.bf16 %v732_v13, %v732_v13 }
 0x1b8   :  { %971 = vmatprep.mubr.bf16.mxu1 %v734_v14 }
 0x1b9   :  { %972 = vmatmul.mubr.bf16.vlgmr.msra.gmra.mrb[4].mxu1 %v733_v16 }
 0x1ba   :  { %1327 = vmatpush3.bf16.msra.mxu1 %v1541_v15 }
 0x1bb   :  { %1328 = vmatprep.subr.bf16.mxu1 %v1542_v17 }
 0x1be   :  { %1329 = vmatpush3.bf16.msra.mxu1 %v1543_v18 }
 0x1bf   :  { %1330 = vmatprep.subr.bf16.mxu1 %v1544_v19 }
 0x1c2   :  { %1331 = vmatpush3.bf16.msra.mxu1 %v1545_v20 }
 0x1c3   :  { %1332 = vmatprep.subr.bf16.mxu1 %v1546_v21 }
 0x1c6   :  { %1333 = vmatpush3.bf16.msra.mxu1 %v1547_v22 }
 0x1c7   :  { %1334 = vmatprep.subr.bf16.mxu1 %v1548_v23 }
 0x1ca   :  { %1335 = vmatpush3.bf16.msra.mxu1 %v1549_v24 }
 0x1cb   :  { %1336 = vmatprep.subr.bf16.mxu1 %v1550_v25 }
 0x1ce   :  { %1337 = vmatpush3.bf16.msra.mxu1 %v1551_v26 }
 0x1cf   :  { %1338 = vmatprep.subr.bf16.mxu1 %v1552_v27 }
 0x1d2   :  { %1339 = vmatpush3.bf16.msra.mxu1 %v1553_v28 }
 0x1d3   :  { %1340 = vmatprep.subr.bf16.mxu1 %v1554_v29 }
 0x1d6   :  { %1341 = vmatpush3.bf16.msra.mxu1 %v1555_v30 }
 0x28c   :  { %v973_v35 = vpop.f32.mrb[4].mxu1 }
 0x28d   :  { %v974_v36 = vadd.f32 %v973_v35, %v772_v32  ;;  %v975_v38 = vpop.f32.mrb[5].mxu1 }
 0x28e   :  { %v976_v39 = vadd.f32 %v975_v38, %v776_v34  ;;  %v977_v41 = vpop.f32.mrb[6].mxu1 }
 0x28f   :  { %v980_v42 = vmax.f32 %v974_v36, 0.0  ;;  %v978_v43 = vpop.f32.mrb[7].mxu1 }
 0x290   :  { %v981_v44 = vmax.f32 %v976_v39, 0.0 }
 0x291   :  { %v985_v45 = vmul.f32 %v983_v37, %v980_v42 }
 0x292   :  { %v986_v46 = vmul.f32 %v984_v40, %v981_v44 }
 0x293   :  { %v987_v48 = vpack.c.bf16 %v985_v45, %v985_v45 }
 0x294   :  { %v988_v47 = vpack.c.bf16 %v986_v46, %v986_v46 }
 0x296   :  { %1156 = vmatprep.mubr.bf16.mxu1 %v988_v47 }
 0x297   :  { %1157 = vmatmul.mubr.bf16.vlgmr.msra.gmra.mrb[8].mxu1 %v987_v48 }
 0x36a   :  { %v1342_v49 = vpop.f32.mrb[8].mxu1 }
 0x36b   :  { %v1343_v50 = vpop.f32.mrb[9].mxu1 }
 0x36c   :  { %v1344_v53 = vadd.f32 %v1343_v50, %v1342_v49  ;;  %v1345_v54 = vpop.f32.mrb[10].mxu1 }
 0x36d   :  { %v1346_v55 = vpop.f32.mrb[11].mxu1 }
 0x36e   :  { %v1159_v56 = vadd.f32 %v1344_v53, %v1309_v51 }
 0x370   :  { %1164 = vmax.xlane.f32.xlu0 %v1159_v56 }
 0x3fd   :  { %v1165_v57 = vpop.xlane.xlu0 %1164 }
 0x3fe   :  { %v1166_v58 = vsub.f32 %v1159_v56, %v1165_v57 }
 0x400   :  { %v1167_v59 = vmul.f32 1.442695, %v1166_v58 }
 0x402   :  { %1556 = vpow2.f32 %v1167_v59 }
 0x40c   :  { %v1557_v60 = vpop.eup %1556 }
 0x40d   :  { %1169 = vadd.xlane.f32.xlu0 %v1557_v60 }
 0x49a   :  { %v1170_v52 = vpop.xlane.xlu0 %1169 }
 0x49b   :  { %1558 = vlog2.f32 %v1170_v52 }
 0x4a5   :  { %v1559_v61 = vpop.eup %1558 }
 0x4a6   :  { %v1172_v62 = vmul.f32 0.6931472, %v1559_v61 }
 0x4a8   :  { %v1173_v63 = vsub.f32 %v1166_v58, %v1172_v62 }
 0x4aa   :  { %1174 = vst [vmem:[#allocation11] sm:$0xff] %v1173_v63 }
 0x4ab   :  { %1681 = shalt.err (!%p1678_p2)
}
 0x4ac   :  { %s1682_s27 = scalar_lea.hbm %s1863_s8, 128 }
 0x4ad   :  { %p1683_p3 = scmp.ne.s32.totalorder %s1863_s8, %s1682_s27  ;;  %p1686_p4 = scmp.lt.u32.totalorder %s1682_s27, %s1863_s8 }
 0x4af   :  { %p1688_p5 = pnand %p1686_p4, %p1683_p3 }
 0x4b1   :  { %1691 = shalt.err (!%p1688_p5)
}
 0x4b2   :  { %1184 = dma.vmem_to_hbm [thread:$0]  %s1182_s24, 128, %s1863_s8, [#allocation4]  }
 0x4b3   :  { %1698 = dma.done.wait [#allocation4], 128  }
 0x4b4   :  { %1699 = vsyncadd [#allocation4], 4294967168 }
 0x4b5   :  { %1188 = vsyncpa [#allocation3], 1 }
 0x4b6   :  { %1189 = vsyncpa [#allocation6], 1 }
 0x4b7   :  { %1190 = vsyncpa [#allocation9], 1 }
 0x4b8   :  { %1191 = vsyncpa [#allocation4], 1 }

</bundles_post_ra>
